<compile_context>
chip_gen: v7x
topology: tpu7x:2x2x1
jax: 0.10.0
libtpu: 0.0.40
codegen_flags: <defaults>
</compile_context>

<pallas_src>
import functools

import jax
import jax.numpy as jnp
import numpy as np
from jax.experimental import pallas as pl
from jax.experimental.pallas import tpu as pltpu

BN_EPS = 1e-5


def _round_up(x, m):
    return (x + m - 1) // m * m


# ---------------------------------------------------------------------------
# Fused kernel: bn1 -> relu -> conv1 -> bn2 -> relu -> conv2 (all in VMEM).
# Layout inside the kernel: (C, N*H*W) — channels on sublanes, batch*spatial on lanes.
# ---------------------------------------------------------------------------
def _lvb_kernel(x_ref, mask_ref, g1_ref, b1_ref, w1_ref, g2_ref, b2_ref, w2_ref,
                o_ref, *, W, KH, KW):
    NHW = x_ref.shape[1]
    inv_count = 1.0 / NHW

    # Static per-tap shifts along the flat lane axis, dy-major / dx-minor
    # (same ordering as the mask rows and the flattened-weight columns).
    shifts = []
    for dy in range(KH):
        for dx in range(KW):
            shifts.append((dy - KH // 2) * W + (dx - KW // 2))

    mask = mask_ref[...]                        # (KH*KW, NHW) 0/1 f32, loaded once

    def bn_relu(v, g_ref, b_ref):
        # Training-mode batch stats per channel (per row) over all N*H*W lanes.
        mean = jnp.sum(v, axis=1, keepdims=True) * inv_count
        d = v - mean
        var = jnp.sum(d * d, axis=1, keepdims=True) * inv_count   # biased variance
        scale = g_ref[...] * jax.lax.rsqrt(var + BN_EPS)          # (C, 1)
        return jnp.maximum(d * scale + b_ref[...], 0.0)           # folded FMA + ReLU

    def conv(v, w_ref):
        # v: (Cpad, NHW).  One im2col slab, one MXU matmul.
        pieces = []
        for t, k in enumerate(shifts):
            if k == 0:
                pieces.append(v)                                  # center tap: identity
            else:
                xs = pltpu.roll(v, shift=(-k) % NHW, axis=1)      # xs[:, p] = v[:, p+k]
                pieces.append(xs * mask[t:t + 1, :])              # zero off-image taps
        slab = jnp.concatenate(pieces, axis=0)                    # (KH*KW*Cpad, NHW)
        return jnp.dot(w_ref[...], slab, preferred_element_type=jnp.float32)

    e = bn_relu(x_ref[...].astype(jnp.float32), g1_ref, b1_ref)
    e = conv(e, w1_ref)
    e = bn_relu(e, g2_ref, b2_ref)
    e = conv(e, w2_ref)
    o_ref[...] = e.astype(o_ref.dtype)


# ---------------------------------------------------------------------------
# LearnVectorBlock forward (public wrapper, NCHW in / NCHW out).
# ---------------------------------------------------------------------------
@jax.jit
def learn_vector_block(x_nchw, params):
    N, Cin, H, W = x_nchw.shape
    KH, KW, _, Cout = params["w1"].shape
    assert KH % 2 == 1 and KW % 2 == 1, "padding=k//2 matches 'same' only for odd kernels"
    HW = H * W
    NHW = N * HW
    Cp_in = _round_up(Cin, 8)
    Cp_out = _round_up(Cout, 8)

    # (N, Cin, H, W) -> (Cin, N*HW); zero-pad channels to a sublane multiple.
    x_cn = jnp.transpose(x_nchw, (1, 0, 2, 3)).reshape(Cin, NHW).astype(jnp.float32)
    x_cn = jnp.pad(x_cn, ((0, Cp_in - Cin), (0, 0)))

    # Static "same"-padding validity masks per tap, tiled across the batch.
    hh = np.arange(HW) // W
    ww = np.arange(HW) % W
    rows = []
    for dy in range(KH):
        oy = dy - KH // 2
        for dx in range(KW):
            ox = dx - KW // 2
            rows.append((hh + oy >= 0) & (hh + oy < H) & (ww + ox >= 0) & (ww + ox < W))
    mask = jnp.asarray(np.tile(np.stack(rows).astype(np.float32), (1, N)))  # (KH*KW, NHW)

    # Flatten conv weights to (Cp_out, KH*KW*Cp_in) with column order (dy, dx, ci),
    # matching the slab row order t*Cp_in + ci. Zero rows/cols for padded channels.
    def flat_weight(w_hwio, cin, cp_in):
        kh, kw, _, cout = w_hwio.shape
        wt = jnp.transpose(w_hwio, (3, 0, 1, 2)).astype(jnp.float32)  # (Cout,KH,KW,Cin)
        wt = jnp.pad(wt, ((0, Cp_out - cout), (0, 0), (0, 0), (0, cp_in - cin)))
        return wt.reshape(Cp_out, kh * kw * cp_in)

    w1f = flat_weight(params["w1"], Cin, Cp_in)        # (Cp_out, KH*KW*Cp_in)
    w2f = flat_weight(params["w2"], Cout, Cp_out)      # (Cp_out, KH*KW*Cp_out)

    def pad_vec(v, cp):
        v = v.astype(jnp.float32).reshape(-1, 1)
        return jnp.pad(v, ((0, cp - v.shape[0]), (0, 0)))

    g1 = pad_vec(params["gamma1"], Cp_in)
    b1 = pad_vec(params["beta1"], Cp_in)
    g2 = pad_vec(params["gamma2"], Cp_out)
    b2 = pad_vec(params["beta2"], Cp_out)

    kern = functools.partial(_lvb_kernel, W=W, KH=KH, KW=KW)
    vmem = lambda: pl.BlockSpec(memory_space=pltpu.MemorySpace.VMEM)
    out = pl.pallas_call(
        kern,
        out_shape=jax.ShapeDtypeStruct((Cp_out, NHW), x_nchw.dtype),
        in_specs=[vmem() for _ in range(8)],
        out_specs=vmem(),
    )(x_cn, mask, g1, b1, w1f, g2, b2, w2f)

    out = out[:Cout].reshape(Cout, N, H, W)
    return jnp.transpose(out, (1, 0, 2, 3))            # back to NCHW


# ---------------------------------------------------------------------------
# Pure-JAX reference for validation (NCHW).
# ---------------------------------------------------------------------------
def _reference(x_nchw, params):
    def bn_relu(x, g, b):
        mean = x.mean(axis=(0, 2, 3), keepdims=True)
        var = ((x - mean) ** 2).mean(axis=(0, 2, 3), keepdims=True)
        y = (x - mean) * jax.lax.rsqrt(var + BN_EPS) * g[None, :, None, None] \
            + b[None, :, None, None]
        return jnp.maximum(y, 0.0)

    def conv(x, w_hwio):
        kh, kw = w_hwio.shape[0], w_hwio.shape[1]
        w_oihw = jnp.transpose(w_hwio, (3, 2, 0, 1))
        return jax.lax.conv_general_dilated(
            x, w_oihw, window_strides=(1, 1),
            padding=[(kh // 2, kh // 2), (kw // 2, kw // 2)],
            dimension_numbers=("NCHW", "OIHW", "NCHW"))

    e = bn_relu(x_nchw, params["gamma1"], params["beta1"])
    e = conv(e, params["w1"])
    e = bn_relu(e, params["gamma2"], params["beta2"])
    e = conv(e, params["w2"])
    return e


if __name__ == "__main__":
    # Module config: input_shape=[N, C, H, W]=[2, 4, 16, 16], featmaps=8, filter_size=(3, 3)
    N, Cin, H, W = 2, 4, 16, 16
    featmaps, KH, KW = 8, 3, 3

    key = jax.random.PRNGKey(0)
    kx, kw1, kw2, kg1, kb1, kg2, kb2 = jax.random.split(key, 7)

    x = jax.random.normal(kx, (N, Cin, H, W), jnp.float32)
    params = {
        # conv weights stored HWIO (PyTorch's OIHW reordered), bias=False
        "w1": 0.1 * jax.random.normal(kw1, (KH, KW, Cin, featmaps), jnp.float32),
        "w2": 0.1 * jax.random.normal(kw2, (KH, KW, featmaps, featmaps), jnp.float32),
        "gamma1": 1.0 + 0.1 * jax.random.normal(kg1, (Cin,), jnp.float32),
        "beta1": 0.1 * jax.random.normal(kb1, (Cin,), jnp.float32),
        "gamma2": 1.0 + 0.1 * jax.random.normal(kg2, (featmaps,), jnp.float32),
        "beta2": 0.1 * jax.random.normal(kb2, (featmaps,), jnp.float32),
    }

    out = jax.block_until_ready(learn_vector_block(x, params))
    ref = jax.block_until_ready(_reference(x, params))

    assert out.shape == (N, featmaps, H, W), out.shape
    err = float(jnp.max(jnp.abs(out - ref)))
    assert jnp.allclose(out, ref, rtol=1e-4, atol=1e-4), err
    print("KERNEL_OK")
</pallas_src>

<mosaic_0001>
module attributes {stable_mosaic.version = 11 : i64} {
  func.func @_lvb_kernel(%arg0: memref<8x512xf32, #tpu.memory_space<vmem>>, %arg1: memref<9x512xf32, #tpu.memory_space<vmem>>, %arg2: memref<8x1xf32, #tpu.memory_space<vmem>>, %arg3: memref<8x1xf32, #tpu.memory_space<vmem>>, %arg4: memref<8x72xf32, #tpu.memory_space<vmem>>, %arg5: memref<8x1xf32, #tpu.memory_space<vmem>>, %arg6: memref<8x1xf32, #tpu.memory_space<vmem>>, %arg7: memref<8x72xf32, #tpu.memory_space<vmem>>, %arg8: memref<8x512xf32, #tpu.memory_space<vmem>>) attributes {dimension_semantics = [], scalar_prefetch = 0 : i64, scratch_operands = 0 : i64, tpu.core_type = #tpu.core_type<tc>} {
    %c0 = arith.constant 0 : index
    %c0_0 = arith.constant 0 : index
    %0 = vector.load %arg1[%c0, %c0_0] : memref<9x512xf32, #tpu.memory_space<vmem>>, vector<9x512xf32>
    %c0_1 = arith.constant 0 : index
    %c0_2 = arith.constant 0 : index
    %1 = vector.load %arg0[%c0_1, %c0_2] : memref<8x512xf32, #tpu.memory_space<vmem>>, vector<8x512xf32>
    %cst = arith.constant dense<0.000000e+00> : vector<8xf32>
    %2 = vector.multi_reduction <add>, %1, %cst [1] : vector<8x512xf32> to vector<8xf32>
    %3 = vector.shape_cast %2 : vector<8xf32> to vector<8x1xf32>
    %cst_3 = arith.constant 0.001953125 : f32
    %4 = vector.broadcast %cst_3 : f32 to vector<8x1xf32>
    %5 = arith.mulf %3, %4 : vector<8x1xf32>
    %6 = vector.broadcast %5 : vector<8x1xf32> to vector<8x512xf32>
    %7 = arith.subf %1, %6 : vector<8x512xf32>
    %8 = arith.mulf %7, %7 : vector<8x512xf32>
    %cst_4 = arith.constant dense<0.000000e+00> : vector<8xf32>
    %9 = vector.multi_reduction <add>, %8, %cst_4 [1] : vector<8x512xf32> to vector<8xf32>
    %10 = vector.shape_cast %9 : vector<8xf32> to vector<8x1xf32>
    %cst_5 = arith.constant 0.001953125 : f32
    %11 = vector.broadcast %cst_5 : f32 to vector<8x1xf32>
    %12 = arith.mulf %10, %11 : vector<8x1xf32>
    %c0_6 = arith.constant 0 : index
    %c0_7 = arith.constant 0 : index
    %13 = vector.load %arg2[%c0_6, %c0_7] : memref<8x1xf32, #tpu.memory_space<vmem>>, vector<8x1xf32>
    %cst_8 = arith.constant 9.99999974E-6 : f32
    %14 = vector.broadcast %cst_8 : f32 to vector<8x1xf32>
    %15 = arith.addf %12, %14 : vector<8x1xf32>
    %16 = math.rsqrt %15 : vector<8x1xf32>
    %17 = arith.mulf %13, %16 : vector<8x1xf32>
    %18 = vector.broadcast %17 : vector<8x1xf32> to vector<8x512xf32>
    %19 = arith.mulf %7, %18 : vector<8x512xf32>
    %c0_9 = arith.constant 0 : index
    %c0_10 = arith.constant 0 : index
    %20 = vector.load %arg3[%c0_9, %c0_10] : memref<8x1xf32, #tpu.memory_space<vmem>>, vector<8x1xf32>
    %21 = vector.broadcast %20 : vector<8x1xf32> to vector<8x512xf32>
    %22 = arith.addf %19, %21 : vector<8x512xf32>
    %cst_11 = arith.constant 0.000000e+00 : f32
    %23 = vector.broadcast %cst_11 : f32 to vector<8x512xf32>
    %24 = arith.maximumf %22, %23 : vector<8x512xf32>
    %c17_i32 = arith.constant 17 : i32
    %25 = tpu.dynamic_rotate %24 by %c17_i32 dim 1 : vector<8x512xf32>, i32 -> vector<8x512xf32>
    %26 = vector.extract_strided_slice %0 {offsets = [0, 0], sizes = [1, 512], strides = [1, 1]} : vector<9x512xf32> to vector<1x512xf32>
    %27 = vector.broadcast %26 : vector<1x512xf32> to vector<8x512xf32>
    %28 = arith.mulf %25, %27 : vector<8x512xf32>
    %c16_i32 = arith.constant 16 : i32
    %29 = tpu.dynamic_rotate %24 by %c16_i32 dim 1 : vector<8x512xf32>, i32 -> vector<8x512xf32>
    %30 = vector.extract_strided_slice %0 {offsets = [1, 0], sizes = [1, 512], strides = [1, 1]} : vector<9x512xf32> to vector<1x512xf32>
    %31 = vector.broadcast %30 : vector<1x512xf32> to vector<8x512xf32>
    %32 = arith.mulf %29, %31 : vector<8x512xf32>
    %c15_i32 = arith.constant 15 : i32
    %33 = tpu.dynamic_rotate %24 by %c15_i32 dim 1 : vector<8x512xf32>, i32 -> vector<8x512xf32>
    %34 = vector.extract_strided_slice %0 {offsets = [2, 0], sizes = [1, 512], strides = [1, 1]} : vector<9x512xf32> to vector<1x512xf32>
    %35 = vector.broadcast %34 : vector<1x512xf32> to vector<8x512xf32>
    %36 = arith.mulf %33, %35 : vector<8x512xf32>
    %c1_i32 = arith.constant 1 : i32
    %37 = tpu.dynamic_rotate %24 by %c1_i32 dim 1 : vector<8x512xf32>, i32 -> vector<8x512xf32>
    %38 = vector.extract_strided_slice %0 {offsets = [3, 0], sizes = [1, 512], strides = [1, 1]} : vector<9x512xf32> to vector<1x512xf32>
    %39 = vector.broadcast %38 : vector<1x512xf32> to vector<8x512xf32>
    %40 = arith.mulf %37, %39 : vector<8x512xf32>
    %c511_i32 = arith.constant 511 : i32
    %41 = tpu.dynamic_rotate %24 by %c511_i32 dim 1 : vector<8x512xf32>, i32 -> vector<8x512xf32>
    %42 = vector.extract_strided_slice %0 {offsets = [5, 0], sizes = [1, 512], strides = [1, 1]} : vector<9x512xf32> to vector<1x512xf32>
    %43 = vector.broadcast %42 : vector<1x512xf32> to vector<8x512xf32>
    %44 = arith.mulf %41, %43 : vector<8x512xf32>
    %c497_i32 = arith.constant 497 : i32
    %45 = tpu.dynamic_rotate %24 by %c497_i32 dim 1 : vector<8x512xf32>, i32 -> vector<8x512xf32>
    %46 = vector.extract_strided_slice %0 {offsets = [6, 0], sizes = [1, 512], strides = [1, 1]} : vector<9x512xf32> to vector<1x512xf32>
    %47 = vector.broadcast %46 : vector<1x512xf32> to vector<8x512xf32>
    %48 = arith.mulf %45, %47 : vector<8x512xf32>
    %c496_i32 = arith.constant 496 : i32
    %49 = tpu.dynamic_rotate %24 by %c496_i32 dim 1 : vector<8x512xf32>, i32 -> vector<8x512xf32>
    %50 = vector.extract_strided_slice %0 {offsets = [7, 0], sizes = [1, 512], strides = [1, 1]} : vector<9x512xf32> to vector<1x512xf32>
    %51 = vector.broadcast %50 : vector<1x512xf32> to vector<8x512xf32>
    %52 = arith.mulf %49, %51 : vector<8x512xf32>
    %c495_i32 = arith.constant 495 : i32
    %53 = tpu.dynamic_rotate %24 by %c495_i32 dim 1 : vector<8x512xf32>, i32 -> vector<8x512xf32>
    %54 = vector.extract_strided_slice %0 {offsets = [8, 0], sizes = [1, 512], strides = [1, 1]} : vector<9x512xf32> to vector<1x512xf32>
    %55 = vector.broadcast %54 : vector<1x512xf32> to vector<8x512xf32>
    %56 = arith.mulf %53, %55 : vector<8x512xf32>
    %57 = tpu.concatenate %28, %32, %36, %40, %24, %44, %48, %52, %56 in 0 : vector<8x512xf32>, vector<8x512xf32>, vector<8x512xf32>, vector<8x512xf32>, vector<8x512xf32>, vector<8x512xf32>, vector<8x512xf32>, vector<8x512xf32>, vector<8x512xf32> -> vector<72x512xf32>
    %c0_12 = arith.constant 0 : index
    %c0_13 = arith.constant 0 : index
    %58 = vector.load %arg4[%c0_12, %c0_13] : memref<8x72xf32, #tpu.memory_space<vmem>>, vector<8x72xf32>
    %cst_14 = arith.constant dense<0.000000e+00> : vector<8x512xf32>
    %59 = tpu.matmul %58, %57, %cst_14 {dimension_numbers = #tpu.dot_dimension_numbers<[1], [0], [0], [1], [0, 0, 1, 1], [], []>} : vector<8x72xf32>, vector<72x512xf32>, vector<8x512xf32> -> vector<8x512xf32>
    %cst_15 = arith.constant dense<0.000000e+00> : vector<8xf32>
    %60 = vector.multi_reduction <add>, %59, %cst_15 [1] : vector<8x512xf32> to vector<8xf32>
    %61 = vector.shape_cast %60 : vector<8xf32> to vector<8x1xf32>
    %cst_16 = arith.constant 0.001953125 : f32
    %62 = vector.broadcast %cst_16 : f32 to vector<8x1xf32>
    %63 = arith.mulf %61, %62 : vector<8x1xf32>
    %64 = vector.broadcast %63 : vector<8x1xf32> to vector<8x512xf32>
    %65 = arith.subf %59, %64 : vector<8x512xf32>
    %66 = arith.mulf %65, %65 : vector<8x512xf32>
    %cst_17 = arith.constant dense<0.000000e+00> : vector<8xf32>
    %67 = vector.multi_reduction <add>, %66, %cst_17 [1] : vector<8x512xf32> to vector<8xf32>
    %68 = vector.shape_cast %67 : vector<8xf32> to vector<8x1xf32>
    %cst_18 = arith.constant 0.001953125 : f32
    %69 = vector.broadcast %cst_18 : f32 to vector<8x1xf32>
    %70 = arith.mulf %68, %69 : vector<8x1xf32>
    %c0_19 = arith.constant 0 : index
    %c0_20 = arith.constant 0 : index
    %71 = vector.load %arg5[%c0_19, %c0_20] : memref<8x1xf32, #tpu.memory_space<vmem>>, vector<8x1xf32>
    %cst_21 = arith.constant 9.99999974E-6 : f32
    %72 = vector.broadcast %cst_21 : f32 to vector<8x1xf32>
    %73 = arith.addf %70, %72 : vector<8x1xf32>
    %74 = math.rsqrt %73 : vector<8x1xf32>
    %75 = arith.mulf %71, %74 : vector<8x1xf32>
    %76 = vector.broadcast %75 : vector<8x1xf32> to vector<8x512xf32>
    %77 = arith.mulf %65, %76 : vector<8x512xf32>
    %c0_22 = arith.constant 0 : index
    %c0_23 = arith.constant 0 : index
    %78 = vector.load %arg6[%c0_22, %c0_23] : memref<8x1xf32, #tpu.memory_space<vmem>>, vector<8x1xf32>
    %79 = vector.broadcast %78 : vector<8x1xf32> to vector<8x512xf32>
    %80 = arith.addf %77, %79 : vector<8x512xf32>
    %cst_24 = arith.constant 0.000000e+00 : f32
    %81 = vector.broadcast %cst_24 : f32 to vector<8x512xf32>
    %82 = arith.maximumf %80, %81 : vector<8x512xf32>
    %c17_i32_25 = arith.constant 17 : i32
    %83 = tpu.dynamic_rotate %82 by %c17_i32_25 dim 1 : vector<8x512xf32>, i32 -> vector<8x512xf32>
    %84 = vector.extract_strided_slice %0 {offsets = [0, 0], sizes = [1, 512], strides = [1, 1]} : vector<9x512xf32> to vector<1x512xf32>
    %85 = vector.broadcast %84 : vector<1x512xf32> to vector<8x512xf32>
    %86 = arith.mulf %83, %85 : vector<8x512xf32>
    %c16_i32_26 = arith.constant 16 : i32
    %87 = tpu.dynamic_rotate %82 by %c16_i32_26 dim 1 : vector<8x512xf32>, i32 -> vector<8x512xf32>
    %88 = vector.extract_strided_slice %0 {offsets = [1, 0], sizes = [1, 512], strides = [1, 1]} : vector<9x512xf32> to vector<1x512xf32>
    %89 = vector.broadcast %88 : vector<1x512xf32> to vector<8x512xf32>
    %90 = arith.mulf %87, %89 : vector<8x512xf32>
    %c15_i32_27 = arith.constant 15 : i32
    %91 = tpu.dynamic_rotate %82 by %c15_i32_27 dim 1 : vector<8x512xf32>, i32 -> vector<8x512xf32>
    %92 = vector.extract_strided_slice %0 {offsets = [2, 0], sizes = [1, 512], strides = [1, 1]} : vector<9x512xf32> to vector<1x512xf32>
    %93 = vector.broadcast %92 : vector<1x512xf32> to vector<8x512xf32>
    %94 = arith.mulf %91, %93 : vector<8x512xf32>
    %c1_i32_28 = arith.constant 1 : i32
    %95 = tpu.dynamic_rotate %82 by %c1_i32_28 dim 1 : vector<8x512xf32>, i32 -> vector<8x512xf32>
    %96 = vector.extract_strided_slice %0 {offsets = [3, 0], sizes = [1, 512], strides = [1, 1]} : vector<9x512xf32> to vector<1x512xf32>
    %97 = vector.broadcast %96 : vector<1x512xf32> to vector<8x512xf32>
    %98 = arith.mulf %95, %97 : vector<8x512xf32>
    %c511_i32_29 = arith.constant 511 : i32
    %99 = tpu.dynamic_rotate %82 by %c511_i32_29 dim 1 : vector<8x512xf32>, i32 -> vector<8x512xf32>
    %100 = vector.extract_strided_slice %0 {offsets = [5, 0], sizes = [1, 512], strides = [1, 1]} : vector<9x512xf32> to vector<1x512xf32>
    %101 = vector.broadcast %100 : vector<1x512xf32> to vector<8x512xf32>
    %102 = arith.mulf %99, %101 : vector<8x512xf32>
    %c497_i32_30 = arith.constant 497 : i32
    %103 = tpu.dynamic_rotate %82 by %c497_i32_30 dim 1 : vector<8x512xf32>, i32 -> vector<8x512xf32>
    %104 = vector.extract_strided_slice %0 {offsets = [6, 0], sizes = [1, 512], strides = [1, 1]} : vector<9x512xf32> to vector<1x512xf32>
    %105 = vector.broadcast %104 : vector<1x512xf32> to vector<8x512xf32>
    %106 = arith.mulf %103, %105 : vector<8x512xf32>
    %c496_i32_31 = arith.constant 496 : i32
    %107 = tpu.dynamic_rotate %82 by %c496_i32_31 dim 1 : vector<8x512xf32>, i32 -> vector<8x512xf32>
    %108 = vector.extract_strided_slice %0 {offsets = [7, 0], sizes = [1, 512], strides = [1, 1]} : vector<9x512xf32> to vector<1x512xf32>
    %109 = vector.broadcast %108 : vector<1x512xf32> to vector<8x512xf32>
    %110 = arith.mulf %107, %109 : vector<8x512xf32>
    %c495_i32_32 = arith.constant 495 : i32
    %111 = tpu.dynamic_rotate %82 by %c495_i32_32 dim 1 : vector<8x512xf32>, i32 -> vector<8x512xf32>
    %112 = vector.extract_strided_slice %0 {offsets = [8, 0], sizes = [1, 512], strides = [1, 1]} : vector<9x512xf32> to vector<1x512xf32>
    %113 = vector.broadcast %112 : vector<1x512xf32> to vector<8x512xf32>
    %114 = arith.mulf %111, %113 : vector<8x512xf32>
    %115 = tpu.concatenate %86, %90, %94, %98, %82, %102, %106, %110, %114 in 0 : vector<8x512xf32>, vector<8x512xf32>, vector<8x512xf32>, vector<8x512xf32>, vector<8x512xf32>, vector<8x512xf32>, vector<8x512xf32>, vector<8x512xf32>, vector<8x512xf32> -> vector<72x512xf32>
    %c0_33 = arith.constant 0 : index
    %c0_34 = arith.constant 0 : index
    %116 = vector.load %arg7[%c0_33, %c0_34] : memref<8x72xf32, #tpu.memory_space<vmem>>, vector<8x72xf32>
    %cst_35 = arith.constant dense<0.000000e+00> : vector<8x512xf32>
    %117 = tpu.matmul %116, %115, %cst_35 {dimension_numbers = #tpu.dot_dimension_numbers<[1], [0], [0], [1], [0, 0, 1, 1], [], []>} : vector<8x72xf32>, vector<72x512xf32>, vector<8x512xf32> -> vector<8x512xf32>
    %c0_36 = arith.constant 0 : index
    %c0_37 = arith.constant 0 : index
    %118 = vector.load %arg8[%c0_36, %c0_37] : memref<8x512xf32, #tpu.memory_space<vmem>>, vector<8x512xf32>
    tpu.vector_store %arg8[%c0_36, %c0_37], %117 {strides = array<i32>} : memref<8x512xf32, #tpu.memory_space<vmem>>, vector<8x512xf32>,
    return
  }
}

</mosaic_0001>

<bundles_post_ra>
// kernel: learn_vector_block.1
= control target key start
LH: loop header
LB: loop body
LE: loop exit
PB: predicated region body
PF: predicated region fallthrough
CT: control target
= control target key end

     0   :  { %v918_v20 = vmov 0   ;;  %s921_s16 = smov 15   ;;  %s922_s17 = smov 1   ;;  %v927_v42 = vmov 0.0   ;;  %v96_v43 = vlaneseq  ;;  %vm355_vm8 = vcmask 588800   ;;  %s1518_s0 = inlined_call_operand.vmem [shape: f32[8,512], index: 0, kind: input, shape index: {}]   ;;  %s1519_s2 = inlined_call_operand.vmem [shape: f32[8,1], index: 2, kind: input, shape index: {}]   ;;  %s1520_s3 = inlined_call_operand.vmem [shape: f32[8,1], index: 3, kind: input, shape index: {}]   ;;  %s1521_s1 = inlined_call_operand.vmem [shape: f32[9,512], index: 1, kind: input, shape index: {}]   ;;  %s1522_s4 = inlined_call_operand.vmem [shape: f32[8,72], index: 4, kind: input, shape index: {}]   ;;  %s1523_s6 = inlined_call_operand.vmem [shape: f32[8,1], index: 6, kind: input, shape index: {}]   ;;  %s1524_s5 = inlined_call_operand.vmem [shape: f32[8,1], index: 5, kind: input, shape index: {}]   ;;  %s1525_s7 = inlined_call_operand.vmem [shape: f32[8,72], index: 7, kind: input, shape index: {}]   ;;  %s1526_s8 = inlined_call_operand.vmem [shape: f32[8,512], index: 8, kind: output, shape index: {}]  }
   0x1   :  { %v37_v0 = vld [vmem:[%s1518_s0] sm:$0xff]  ;;  %v38_v1 = vld [vmem:[%s1518_s0 + $0x8] sm:$0xff]  ;;  %v39_v2 = vld [vmem:[%s1518_s0 + $0x10] sm:$0xff]  ;;  %912 = vset.pattern.permute.xlu1 %v918_v20  ;;  %913 = vset.pattern.permute.xlu0 %v918_v20  ;;  %s923_s18 = smov 127   ;;  %s924_s19 = smov 113  }
   0x2   :  { %v41_v3 = vadd.f32 %v38_v1, %v37_v0  ;;  %v40_v4 = vld [vmem:[%s1518_s0 + $0x18] sm:$0xff]  ;;  %v61_v24 = vld [vmem:[%s1519_s2] sm:$0xff]  ;;  %s919_s2 = smov 17   ;;  %s925_s20 = smov 112   ;;  %423 = vmatprep.mubr.f32.mxu0 %v927_v42  ;;  %494 = vmatprep.mubr.f32.mxu1 %v927_v42  ;;  %v1065_v44 = vshrl.u32 %v96_v43, 7  ;;  %v1067_v46 = vand.u32 127, %v96_v43 }
   0x3   :  { %v74_v27 = vld [vmem:[%s1520_s3] sm:$0xff]  ;;  %s920_s3 = smov 16   ;;  %s926_s21 = smov 111   ;;  %v1074_v50 = vld [vmem:[%s1521_s1 + $0x8] sm:$0xff] }
   0x4   :  { %v42_v5 = vadd.f32 %v41_v3, %v39_v2  ;;  %v138_v48 = vsub.s32 1, %v1065_v44  ;;  %v105_v49 = vsub.s32 0, %v1065_v44  ;;  %vm98_vm0 = vcmp.lt.s32.totalorder %v1067_v46, 17  ;;  %v1095_v61 = vld [vmem:[%s1521_s1] sm:$0xff] }
   0x5   :  { %vm131_vm1 = vcmp.lt.s32.totalorder %v1067_v46, 16  ;;  %vm164_vm2 = vcmp.lt.s32.totalorder %v1067_v46, 15  ;;  %vm197_vm3 = vcmp.lt.s32.totalorder %v1067_v46, 1  ;;  %vm230_vm4 = vcmp.lt.s32.totalorder %v1067_v46, 127 }
   0x6   :  { %v43_v6 = vadd.f32 %v42_v5, %v40_v4  ;;  %v1079_v53 = vrot.slane %v1074_v50, %v105_v49  ;;  %v1082_v54 = vrot.slane %v1074_v50, %v138_v48  ;;  %v1106_v3 = vrot.slane %v1095_v61, %v138_v48 }
   0x7   :  { %vm263_vm5 = vcmp.lt.s32.totalorder %v1067_v46, 113  ;;  %vm296_vm6 = vcmp.lt.s32.totalorder %v1067_v46, 112  ;;  %vm329_vm7 = vcmp.lt.s32.totalorder %v1067_v46, 111 }
   0x8   :  { %44 = vadd.xlane.f32.xlu0 %v43_v6 }
  0x95   :  { %v45_v7 = vpop.xlane.xlu0 %44 }
  0x96   :  { %v46_v8 = vmul.f32 0.001953125, %v45_v7 }
  0x98   :  { %v47_v9 = vsub.f32 %v37_v0, %v46_v8  ;;  %v48_v10 = vsub.f32 %v38_v1, %v46_v8  ;;  %v49_v11 = vsub.f32 %v39_v2, %v46_v8  ;;  %v50_v12 = vsub.f32 %v40_v4, %v46_v8  ;;  %v1100_v1 = vld [vmem:[%s1521_s1 + $0x10] sm:$0xff]  ;;  %v1111_v4 = vld [vmem:[%s1521_s1 + $0x18] sm:$0xff] }
  0x99   :  { %v1103_v2 = vrot.slane %v1095_v61, %v105_v49  ;;  %v1116_v8 = vrot.slane %v1100_v1, %v138_v48 }
  0x9a   :  { %v51_v13 = vmul.f32 %v47_v9, %v47_v9  ;;  %v52_v14 = vmul.f32 %v48_v10, %v48_v10  ;;  %v53_v15 = vmul.f32 %v49_v11, %v49_v11  ;;  %v54_v17 = vmul.f32 %v50_v12, %v50_v12 }
  0x9c   :  { %v55_v16 = vadd.f32 %v52_v14, %v51_v13  ;;  %v1126_v13 = vrot.slane %v1100_v1, %v105_v49  ;;  %v1129_v14 = vrot.slane %v1111_v4, %v105_v49 }
  0x9e   :  { %v56_v18 = vadd.f32 %v55_v16, %v53_v15 }
  0xa0   :  { %v57_v19 = vadd.f32 %v56_v18, %v54_v17 }
  0xa2   :  { %58 = vadd.xlane.f32.xlu0 %v57_v19 }
 0x12f   :  { %v59_v21 = vpop.xlane.xlu0 %58 }
 0x130   :  { %v60_v22 = vmul.f32 0.001953125, %v59_v21 }
 0x132   :  { %v62_v23 = vadd.f32 1e-05, %v60_v22  ;;  %v171_v22 = vsub.s32 2, %v1065_v44 }
 0x134   :  { %914 = vrsqrt.f32 %v62_v23 }
 0x13e   :  { %v915_v25 = vpop.eup %914 }
 0x13f   :  { %v64_v26 = vmul.f32 %v915_v25, %v61_v24 }
 0x141   :  { %67 = vperm.xlu1 %912, %v64_v26  }
 0x145   :  { %77 = vperm.xlu1 %912, %v74_v27   ;;  %v204_v27 = vsub.s32 3, %v1065_v44 }
 0x1c0   :  { %v68_v28 = vpop.permute.xlu1 %67 }
 0x1c1   :  { %v70_v29 = vmul.f32 %v68_v28, %v47_v9  ;;  %v71_v30 = vmul.f32 %v68_v28, %v48_v10  ;;  %v72_v32 = vmul.f32 %v68_v28, %v49_v11  ;;  %v73_v39 = vmul.f32 %v68_v28, %v50_v12 }
 0x1c2   :  { %v1121_v10 = vrot.slane %v1111_v4, %v138_v48  ;;  %v1164_v48 = vrot.slane %v1095_v61, %v171_v22 }
 0x1c4   :  { %v78_v31 = vpop.permute.xlu1 %77 }
 0x1c5   :  { %v80_v33 = vadd.f32 %v78_v31, %v70_v29  ;;  %v81_v34 = vadd.f32 %v78_v31, %v71_v30  ;;  %v82_v35 = vadd.f32 %v78_v31, %v72_v32  ;;  %v83_v40 = vadd.f32 %v78_v31, %v73_v39 }
 0x1c6   :  { %v1147_v32 = vrot.slane %v1074_v50, %v171_v22 }
 0x1c7   :  { %v991_v36 = vmax.f32 %v80_v33, 0.0  ;;  %v993_v37 = vmax.f32 %v81_v34, 0.0  ;;  %v999_v38 = vmax.f32 %v82_v35, 0.0  ;;  %v1009_v41 = vmax.f32 %v83_v40, 0.0 }
 0x1c8   :  { %v1150_v33 = vrot.slane %v1074_v50, %v204_v27 }
 0x1c9   :  { %90 = vrot.lane.b32.xlu1 %v993_v37, %s919_s2  ;;  %88 = vrot.lane.b32.xlu0 %v991_v36, %s919_s2 }
 0x1cd   :  { %123 = vrot.lane.b32.xlu1 %v991_v36, %s920_s3  ;;  %127 = vrot.lane.b32.xlu0 %v999_v38, %s920_s3 }
 0x1d1   :  { %125 = vrot.lane.b32.xlu1 %v993_v37, %s920_s3  ;;  %158 = vrot.lane.b32.xlu0 %v993_v37, %s921_s16 }
 0x1d5   :  { %94 = vrot.lane.b32.xlu1 %v1009_v41, %s919_s2  ;;  %191 = vrot.lane.b32.xlu0 %v993_v37, %s922_s17 }
 0x1d9   :  { %129 = vrot.lane.b32.xlu1 %v1009_v41, %s920_s3  ;;  %195 = vrot.lane.b32.xlu0 %v1009_v41, %s922_s17 }
 0x1dd   :  { %92 = vrot.lane.b32.xlu1 %v999_v38, %s919_s2  ;;  %193 = vrot.lane.b32.xlu0 %v999_v38, %s922_s17 }
 0x1e1   :  { %156 = vrot.lane.b32.xlu1 %v991_v36, %s921_s16  ;;  %226 = vrot.lane.b32.xlu0 %v999_v38, %s923_s18 }
 0x1e5   :  { %189 = vrot.lane.b32.xlu1 %v991_v36, %s922_s17  ;;  %228 = vrot.lane.b32.xlu0 %v1009_v41, %s923_s18 }
 0x1e9   :  { %162 = vrot.lane.b32.xlu1 %v1009_v41, %s921_s16  ;;  %259 = vrot.lane.b32.xlu0 %v999_v38, %s924_s19 }
 0x1ed   :  { %160 = vrot.lane.b32.xlu1 %v999_v38, %s921_s16  ;;  %292 = vrot.lane.b32.xlu0 %v999_v38, %s925_s20 }
 0x1f1   :  { %224 = vrot.lane.b32.xlu1 %v993_v37, %s923_s18  ;;  %288 = vrot.lane.b32.xlu0 %v991_v36, %s925_s20 }
 0x1f5   :  { %222 = vrot.lane.b32.xlu1 %v991_v36, %s923_s18  ;;  %294 = vrot.lane.b32.xlu0 %v1009_v41, %s925_s20 }
 0x1f9   :  { %257 = vrot.lane.b32.xlu1 %v993_v37, %s924_s19  ;;  %325 = vrot.lane.b32.xlu0 %v999_v38, %s926_s21 }
 0x1fd   :  { %290 = vrot.lane.b32.xlu1 %v993_v37, %s925_s20  ;;  %327 = vrot.lane.b32.xlu0 %v1009_v41, %s926_s21 }
 0x201   :  { %255 = vrot.lane.b32.xlu1 %v991_v36, %s924_s19 }
 0x205   :  { %261 = vrot.lane.b32.xlu1 %v1009_v41, %s924_s19 }
 0x209   :  { %323 = vrot.lane.b32.xlu1 %v993_v37, %s926_s21 }
 0x20d   :  { %321 = vrot.lane.b32.xlu1 %v991_v36, %s926_s21 }
 0x23b   :  { %v91_v45 = vpop.permute.xlu1 %90  ;;  %v89_v47 = vpop.permute.xlu0 %88 }
 0x23c   :  { %v101_v55 = vsel %vm98_vm0, %v89_v47, %v91_v45 }
 0x23d   :  { %v120_v59 = vmul.f32 %v1079_v53, %v101_v55  ;;  %v1169_v55 = vrot.slane %v1100_v1, %v204_v27 }
 0x23f   :  { %v124_v51 = vpop.permute.xlu1 %123  ;;  %v128_v52 = vpop.permute.xlu0 %127 }
 0x243   :  { %v126_v56 = vpop.permute.xlu1 %125  ;;  %v1086_v57 = vpop.permute.xlu0 %158 }
 0x244   :  { %v134_v58 = vsel %vm131_vm1, %v124_v51, %v126_v56  ;;  %v133_v15 = vsel %vm131_vm1, %v126_v56, %v128_v52  ;;  %v1172_v56 = vrot.slane %v1111_v4, %v204_v27 }
 0x245   :  { %v153_v60 = vmul.f32 %v1082_v54, %v134_v58  ;;  %v154_v23 = vmul.f32 %v1116_v8, %v133_v15 }
 0x247   :  { %v95_v62 = vpop.permute.xlu1 %94  ;;  %v192_v63 = vpop.permute.xlu0 %191  ;;  %v838_v0 = vpack.c.bf16 %v153_v60, %v120_v59 }
 0x248   :  { %v102_v5 = vsel %vm98_vm0, %v95_v62, %v89_v47 }
 0x249   :  { %839 = vmatprep.subr.bf16.mxu0 %v838_v0  ;;  %v119_v11 = vmul.f32 %v1103_v2, %v102_v5  ;;  %v1182_v0 = vrot.slane %v1111_v4, %v171_v22 }
 0x24b   :  { %v130_v6 = vpop.permute.xlu1 %129  ;;  %v196_v7 = vpop.permute.xlu0 %195 }
 0x24c   :  { %v135_v9 = vsel %vm131_vm1, %v130_v6, %v124_v51  ;;  %v132_v16 = vsel %vm131_vm1, %v128_v52, %v130_v6 }
 0x24d   :  { %v152_v12 = vmul.f32 %v1106_v3, %v135_v9  ;;  %v155_v26 = vmul.f32 %v1121_v10, %v132_v16  ;;  %v237_v9 = vsub.s32 5, %v1065_v44 }
 0x24f   :  { %v93_v17 = vpop.permute.xlu1 %92  ;;  %v194_v18 = vpop.permute.xlu0 %193  ;;  %v840_v19 = vpack.c.bf16 %v152_v12, %v119_v11 }
 0x250   :  { %v99_v20 = vsel %vm98_vm0, %v93_v17, %v95_v62  ;;  %v100_v21 = vsel %vm98_vm0, %v91_v45, %v93_v17  ;;  %v1160_v45 = vrot.slane %v1095_v61, %v204_v27  ;;  %v1179_v62 = vrot.slane %v1100_v1, %v171_v22 }
 0x251   :  { %v121_v24 = vmul.f32 %v1126_v13, %v100_v21  ;;  %841 = vmatpush1.bf16.msra.mxu0 %v840_v19  ;;  %v122_v25 = vmul.f32 %v1129_v14, %v99_v20  ;;  %v198_v5 = vsel %vm197_vm3, %v194_v18, %v196_v7  ;;  %v199_v6 = vsel %vm197_vm3, %v192_v63, %v194_v18 }
 0x252   :  { %v1197_v19 = vrot.slane %v1074_v50, %v237_v9 }
 0x253   :  { %v157_v28 = vpop.permute.xlu1 %156  ;;  %v227_v29 = vpop.permute.xlu0 %226  ;;  %v854_v30 = vpack.c.bf16 %v155_v26, %v122_v25  ;;  %v856_v31 = vpack.c.bf16 %v154_v23, %v121_v24  ;;  %v1205_v24 = vrot.slane %v1100_v1, %v237_v9 }
 0x254   :  { %v167_v34 = vsel %vm164_vm2, %v157_v28, %v1086_v57 }
 0x255   :  { %855 = vmatprep.subr.bf16.mxu1 %v854_v30  ;;  %v186_v43 = vmul.f32 %v1147_v32, %v167_v34  ;;  %v1216_v30 = vrot.slane %v1111_v4, %v237_v9 }
 0x256   :  { %857 = vmatpush1.bf16.msra.mxu1 %v856_v31 }
 0x257   :  { %v190_v35 = vpop.permute.xlu1 %189  ;;  %v229_v40 = vpop.permute.xlu0 %228 }
 0x258   :  { %v200_v39 = vsel %vm197_vm3, %v190_v35, %v192_v63  ;;  %v201_v49 = vsel %vm197_vm3, %v196_v7, %v190_v35  ;;  %v220_v7 = vmul.f32 %v1169_v55, %v199_v6  ;;  %v221_v63 = vmul.f32 %v1172_v56, %v198_v5 }
 0x259   :  { %v219_v47 = vmul.f32 %v1150_v33, %v200_v39  ;;  %v218_v59 = vmul.f32 %v1160_v45, %v201_v49  ;;  %v231_v26 = vsel %vm230_vm4, %v227_v29, %v229_v40  ;;  %v270_v49 = vsub.s32 6, %v1065_v44 }
 0x25a   :  { %v253_v35 = vmul.f32 %v1205_v24, %v231_v26 }
 0x25b   :  { %v163_v51 = vpop.permute.xlu1 %162  ;;  %v842_v52 = vpack.c.bf16 %v219_v47, %v186_v43  ;;  %v1189_v11 = vpop.permute.xlu0 %259 }
 0x25c   :  { %v168_v58 = vsel %vm164_vm2, %v163_v51, %v157_v28  ;;  %v1213_v28 = vrot.slane %v1095_v61, %v237_v9 }
 0x25d   :  { %v185_v60 = vmul.f32 %v1164_v48, %v168_v58  ;;  %843 = vmatprep.subr.bf16.mxu0 %v842_v52  ;;  %v303_v52 = vsub.s32 7, %v1065_v44 }
 0x25f   :  { %v161_v12 = vpop.permute.xlu1 %160  ;;  %v844_v15 = vpack.c.bf16 %v218_v59, %v185_v60  ;;  %v864_v60 = vpack.c.bf16 %v253_v35, %v999_v38  ;;  %v1236_v5 = vrot.slane %v1074_v50, %v303_v52  ;;  %v1246_v9 = vrot.slane %v1095_v61, %v303_v52 }
 0x260   :  { %v165_v16 = vsel %vm164_vm2, %v161_v12, %v163_v51  ;;  %v166_v17 = vsel %vm164_vm2, %v1086_v57, %v161_v12  ;;  %v293_v57 = vpop.permute.xlu0 %292  ;;  %v1250_v12 = vrot.slane %v1095_v61, %v270_v49  ;;  %v1265_v61 = vrot.slane %v1100_v1, %v270_v49 }
 0x261   :  { %v187_v18 = vmul.f32 %v1179_v62, %v166_v17  ;;  %v188_v20 = vmul.f32 %v1182_v0, %v165_v16  ;;  %845 = vmatpush1.bf16.msra.mxu0 %v844_v15 }
 0x263   :  { %v225_v21 = vpop.permute.xlu1 %224  ;;  %v858_v22 = vpack.c.bf16 %v221_v63, %v188_v20  ;;  %v860_v23 = vpack.c.bf16 %v220_v7, %v187_v18  ;;  %v1255_v7 = vrot.slane %v1100_v1, %v303_v52  ;;  %v1258_v63 = vrot.slane %v1111_v4, %v303_v52 }
 0x264   :  { %v232_v25 = vsel %vm230_vm4, %v225_v21, %v227_v29  ;;  %v289_v51 = vpop.permute.xlu0 %288 }
 0x265   :  { %v252_v27 = vmul.f32 %v1197_v19, %v232_v25  ;;  %859 = vmatprep.subr.bf16.mxu1 %v858_v22  ;;  %v1268_v22 = vrot.slane %v1111_v4, %v270_v49 }
 0x266   :  { %861 = vmatpush1.bf16.msra.mxu1 %v860_v23 }
 0x267   :  { %v223_v31 = vpop.permute.xlu1 %222  ;;  %v846_v34 = vpack.c.bf16 %v252_v27, %v993_v37 }
 0x268   :  { %v233_v39 = vsel %vm230_vm4, %v223_v31, %v225_v21  ;;  %v234_v29 = vsel %vm230_vm4, %v229_v40, %v223_v31  ;;  %v1233_v40 = vrot.slane %v1074_v50, %v270_v49  ;;  %v295_v6 = vpop.permute.xlu0 %294 }
 0x269   :  { %v251_v43 = vmul.f32 %v1213_v28, %v233_v39  ;;  %v254_v47 = vmul.f32 %v1216_v30, %v234_v29  ;;  %847 = vmatprep.subr.bf16.mxu0 %v846_v34  ;;  %v297_v23 = vsel %vm296_vm6, %v293_v57, %v295_v6  ;;  %v300_v25 = vsel %vm296_vm6, %v295_v6, %v289_v51  ;;  %v1286_v29 = vld [vmem:[%s1521_s1 + $0x28] ss:$0 sm:$0xff] }
 0x26a   :  { %v319_v35 = vmul.f32 %v1255_v7, %v297_v23  ;;  %v320_v4 = vmul.f32 %v1258_v63, %v300_v25 }
 0x26b   :  { %v258_v37 = vpop.permute.xlu1 %257  ;;  %v848_v58 = vpack.c.bf16 %v251_v43, %v991_v36  ;;  %v862_v59 = vpack.c.bf16 %v254_v47, %v1009_v41 }
 0x26c   :  { %v265_v44 = vsel %vm263_vm5, %v258_v37, %v1189_v11  ;;  %v326_v26 = vpop.permute.xlu0 %325 }
 0x26d   :  { %849 = vmatpush1.bf16.msra.mxu0 %v848_v58  ;;  %863 = vmatprep.subr.bf16.mxu1 %v862_v59  ;;  %v285_v41 = vmul.f32 %v1233_v40, %v265_v44  ;;  %v1300_v58 = vld [vmem:[%s1521_s1 + $0x38] ss:$0 sm:$0xff]  ;;  %v1305_v59 = vld [vmem:[%s1521_s1 + $0x30] ss:$0 sm:$0xff] }
 0x26e   :  { %865 = vmatpush1.bf16.msra.mxu1 %v864_v60 }
 0x26f   :  { %v291_v36 = vpop.permute.xlu1 %290 }
 0x270   :  { %v298_v38 = vsel %vm296_vm6, %v291_v36, %v293_v57  ;;  %v299_v15 = vsel %vm296_vm6, %v289_v51, %v291_v36  ;;  %v328_v49 = vpop.permute.xlu0 %327 }
 0x271   :  { %v318_v50 = vmul.f32 %v1236_v5, %v298_v38  ;;  %v317_v20 = vmul.f32 %v1246_v9, %v299_v15  ;;  %v330_v60 = vsel %vm329_vm7, %v326_v26, %v328_v49 }
 0x272   :  { %v352_v15 = vmul.f32 %v1305_v59, %v330_v60 }
 0x273   :  { %v256_v16 = vpop.permute.xlu1 %255  ;;  %v850_v17 = vpack.c.bf16 %v318_v50, %v285_v41  ;;  %v354_v50 = vld [vmem:[%s1522_s4] sm:$0xff] }
 0x274   :  { %v266_v18 = vsel %vm263_vm5, %v256_v16, %v258_v37  ;;  %v1295_v37 = vld [vmem:[%s1521_s1 + $0x20] ss:$0 sm:$0xff] }
 0x275   :  { %v284_v21 = vmul.f32 %v1250_v12, %v266_v18  ;;  %851 = vmatprep.subr.bf16.mxu0 %v850_v17 }
 0x277   :  { %v262_v27 = vpop.permute.xlu1 %261  ;;  %v852_v31 = vpack.c.bf16 %v317_v20, %v284_v21 }
 0x278   :  { %v264_v34 = vsel %vm263_vm5, %v1189_v11, %v262_v27  ;;  %v267_v1 = vsel %vm263_vm5, %v262_v27, %v256_v16 }
 0x279   :  { %v286_v39 = vmul.f32 %v1265_v61, %v264_v34  ;;  %v287_v57 = vmul.f32 %v1268_v22, %v267_v1  ;;  %853 = vmatpush1.bf16.msra.mxu0 %v852_v31 }
 0x27b   :  { %v324_v11 = vpop.permute.xlu1 %323  ;;  %v866_v43 = vpack.c.bf16 %v320_v4, %v287_v57  ;;  %v868_v47 = vpack.c.bf16 %v319_v35, %v286_v39 }
 0x27c   :  { %v331_v51 = vsel %vm329_vm7, %v324_v11, %v326_v26  ;;  %v534_v26 = vld [vmem:[%s1523_s6] sm:$0xff] }
 0x27d   :  { %v351_v52 = vmul.f32 %v1286_v29, %v331_v51  ;;  %867 = vmatprep.subr.bf16.mxu1 %v866_v43 }
 0x27e   :  { %869 = vmatpush1.bf16.msra.mxu1 %v868_v47 }
 0x27f   :  { %v322_v44 = vpop.permute.xlu1 %321  ;;  %375 = vmatprep.subr.mxu0 %v351_v52 }
 0x280   :  { %v332_v36 = vsel %vm329_vm7, %v322_v44, %v324_v11  ;;  %v333_v6 = vsel %vm329_vm7, %v328_v49, %v322_v44  ;;  %v521_v44 = vld [vmem:[%s1524_s5] sm:$0xff] }
 0x281   :  { %v350_v38 = vmul.f32 %v1295_v37, %v332_v36  ;;  %v353_v41 = vmul.f32 %v1300_v58, %v333_v6 }
 0x283   :  { %376 = vmatpush1.msra.mxu0 %v350_v38  ;;  %446 = vmatprep.subr.mxu1 %v353_v41 }
 0x284   :  { %834 = vmatmul.mubr.msk.f32.vlgmr.msra.gmra.mrb[0].mxu0 %vm355_vm8, %v354_v50  ;;  %447 = vmatpush1.msra.mxu1 %v352_v15 }
 0x285   :  { %835 = vmatmul.mubr.msk.f32.vlgmr.msra.gmra.mrb[0].mxu1 %vm355_vm8, %v354_v50  ;;  %744 = vmatprep.mubr.f32.mxu0 %v927_v42 }
 0x286   :  { %815 = vmatprep.mubr.f32.mxu1 %v927_v42 }
 0x357   :  { %v425_v16 = vpop.f32.mrb[0].mxu0 }
 0x358   :  { %v427_v17 = vpop.f32.mrb[1].mxu0  ;;  %v496_v18 = vpop.f32.mrb[0].mxu1 }
 0x359   :  { %v501_v20 = vadd.f32 %v427_v17, %v425_v16  ;;  %v498_v21 = vpop.f32.mrb[1].mxu1 }
 0x35b   :  { %v502_v23 = vadd.f32 %v501_v20, %v496_v18 }
 0x35d   :  { %v503_v25 = vadd.f32 %v502_v23, %v498_v21 }
 0x35f   :  { %504 = vadd.xlane.f32.xlu1 %v503_v25 }
 0x370   :  { %537 = vperm.xlu1 %912, %v534_v26  }
 0x3ec   :  { %v505_v27 = vpop.xlane.xlu1 %504 }
 0x3ed   :  { %v506_v31 = vmul.f32 0.001953125, %v505_v27 }
 0x3ef   :  { %v507_v34 = vsub.f32 %v425_v16, %v506_v31  ;;  %v508_v1 = vsub.f32 %v427_v17, %v506_v31  ;;  %v509_v35 = vsub.f32 %v496_v18, %v506_v31  ;;  %v510_v4 = vsub.f32 %v498_v21, %v506_v31 }
 0x3f0   :  { %v538_v16 = vpop.permute.xlu1 %537 }
 0x3f1   :  { %v511_v42 = vmul.f32 %v507_v34, %v507_v34  ;;  %v512_v39 = vmul.f32 %v508_v1, %v508_v1  ;;  %v513_v57 = vmul.f32 %v509_v35, %v509_v35  ;;  %v514_v43 = vmul.f32 %v510_v4, %v510_v4 }
 0x3f3   :  { %v515_v11 = vadd.f32 %v512_v39, %v511_v42 }
 0x3f5   :  { %v516_v47 = vadd.f32 %v515_v11, %v513_v57 }
 0x3f7   :  { %v517_v49 = vadd.f32 %v516_v47, %v514_v43 }
 0x3f9   :  { %518 = vadd.xlane.f32.xlu0 %v517_v49 }
 0x486   :  { %v519_v51 = vpop.xlane.xlu0 %518 }
 0x487   :  { %v520_v52 = vmul.f32 0.001953125, %v519_v51 }
 0x489   :  { %v522_v60 = vadd.f32 1e-05, %v520_v52 }
 0x48b   :  { %916 = vrsqrt.f32 %v522_v60 }
 0x495   :  { %v917_v36 = vpop.eup %916 }
 0x496   :  { %v524_v6 = vmul.f32 %v917_v36, %v521_v44 }
 0x498   :  { %527 = vperm.xlu0 %913, %v524_v6  }
 0x517   :  { %v528_v38 = vpop.permute.xlu0 %527 }
 0x518   :  { %v530_v41 = vmul.f32 %v528_v38, %v507_v34  ;;  %v531_v50 = vmul.f32 %v528_v38, %v508_v1  ;;  %v532_v15 = vmul.f32 %v528_v38, %v509_v35  ;;  %v533_v25 = vmul.f32 %v528_v38, %v510_v4 }
 0x51a   :  { %v540_v17 = vadd.f32 %v538_v16, %v530_v41  ;;  %v542_v18 = vadd.f32 %v538_v16, %v532_v15  ;;  %v541_v20 = vadd.f32 %v538_v16, %v531_v50  ;;  %v543_v27 = vadd.f32 %v538_v16, %v533_v25 }
 0x51c   :  { %v1329_v21 = vmax.f32 %v540_v17, 0.0  ;;  %v1331_v23 = vmax.f32 %v542_v18, 0.0  ;;  %v1337_v26 = vmax.f32 %v541_v20, 0.0  ;;  %v1347_v31 = vmax.f32 %v543_v27, 0.0 }
 0x51e   :  { %568 = vrot.lane.b32.xlu0 %v1331_v23, %s920_s3  ;;  %548 = vrot.lane.b32.xlu1 %v1329_v21, %s919_s2 }
 0x522   :  { %580 = vrot.lane.b32.xlu0 %v1329_v21, %s921_s16  ;;  %550 = vrot.lane.b32.xlu1 %v1337_v26, %s919_s2 }
 0x526   :  { %584 = vrot.lane.b32.xlu0 %v1331_v23, %s921_s16  ;;  %552 = vrot.lane.b32.xlu1 %v1331_v23, %s919_s2 }
 0x52a   :  { %596 = vrot.lane.b32.xlu0 %v1329_v21, %s922_s17  ;;  %554 = vrot.lane.b32.xlu1 %v1347_v31, %s919_s2 }
 0x52e   :  { %600 = vrot.lane.b32.xlu0 %v1331_v23, %s922_s17  ;;  %564 = vrot.lane.b32.xlu1 %v1329_v21, %s920_s3 }
 0x532   :  { %612 = vrot.lane.b32.xlu0 %v1329_v21, %s923_s18  ;;  %566 = vrot.lane.b32.xlu1 %v1337_v26, %s920_s3 }
 0x536   :  { %616 = vrot.lane.b32.xlu0 %v1331_v23, %s923_s18  ;;  %570 = vrot.lane.b32.xlu1 %v1347_v31, %s920_s3 }
 0x53a   :  { %628 = vrot.lane.b32.xlu0 %v1329_v21, %s924_s19  ;;  %582 = vrot.lane.b32.xlu1 %v1337_v26, %s921_s16 }
 0x53e   :  { %632 = vrot.lane.b32.xlu0 %v1331_v23, %s924_s19  ;;  %586 = vrot.lane.b32.xlu1 %v1347_v31, %s921_s16 }
 0x542   :  { %644 = vrot.lane.b32.xlu0 %v1329_v21, %s925_s20  ;;  %598 = vrot.lane.b32.xlu1 %v1337_v26, %s922_s17 }
 0x546   :  { %648 = vrot.lane.b32.xlu0 %v1331_v23, %s925_s20  ;;  %602 = vrot.lane.b32.xlu1 %v1347_v31, %s922_s17 }
 0x54a   :  { %660 = vrot.lane.b32.xlu0 %v1329_v21, %s926_s21  ;;  %614 = vrot.lane.b32.xlu1 %v1337_v26, %s923_s18 }
 0x54e   :  { %664 = vrot.lane.b32.xlu0 %v1331_v23, %s926_s21  ;;  %618 = vrot.lane.b32.xlu1 %v1347_v31, %s923_s18 }
 0x552   :  { %630 = vrot.lane.b32.xlu1 %v1337_v26, %s924_s19 }
 0x556   :  { %634 = vrot.lane.b32.xlu1 %v1347_v31, %s924_s19 }
 0x55a   :  { %646 = vrot.lane.b32.xlu1 %v1337_v26, %s925_s20 }
 0x55e   :  { %650 = vrot.lane.b32.xlu1 %v1347_v31, %s925_s20 }
 0x562   :  { %662 = vrot.lane.b32.xlu1 %v1337_v26, %s926_s21 }
 0x566   :  { %666 = vrot.lane.b32.xlu1 %v1347_v31, %s926_s21 }
 0x590   :  { %v569_v34 = vpop.permute.xlu0 %568  ;;  %v549_v1 = vpop.permute.xlu1 %548 }
 0x594   :  { %v581_v35 = vpop.permute.xlu0 %580  ;;  %v551_v4 = vpop.permute.xlu1 %550 }
 0x595   :  { %v558_v47 = vsel %vm98_vm0, %v549_v1, %v551_v4 }
 0x596   :  { %v561_v60 = vmul.f32 %v558_v47, %v1079_v53 }
 0x598   :  { %v585_v42 = vpop.permute.xlu0 %584  ;;  %v553_v39 = vpop.permute.xlu1 %552 }
 0x599   :  { %v557_v41 = vsel %vm98_vm0, %v551_v4, %v553_v39 }
 0x59c   :  { %v555_v57 = vpop.permute.xlu1 %554  ;;  %v597_v11 = vpop.permute.xlu0 %596 }
 0x59d   :  { %v556_v6 = vsel %vm98_vm0, %v553_v39, %v555_v57  ;;  %v559_v38 = vsel %vm98_vm0, %v555_v57, %v549_v1  ;;  %v562_v1 = vmul.f32 %v557_v41, %v1126_v13 }
 0x59e   :  { %v563_v18 = vmul.f32 %v556_v6, %v1129_v14 }
 0x5a0   :  { %v565_v43 = vpop.permute.xlu1 %564  ;;  %v601_v49 = vpop.permute.xlu0 %600 }
 0x5a4   :  { %v567_v51 = vpop.permute.xlu1 %566  ;;  %v613_v20 = vpop.permute.xlu0 %612 }
 0x5a5   :  { %v574_v52 = vsel %vm131_vm1, %v565_v43, %v567_v51  ;;  %v573_v44 = vsel %vm131_vm1, %v567_v51, %v569_v34 }
 0x5a6   :  { %v577_v36 = vmul.f32 %v574_v52, %v1082_v54  ;;  %v578_v16 = vmul.f32 %v573_v44, %v1116_v8  ;;  %v560_v54 = vmul.f32 %v559_v38, %v1103_v2 }
 0x5a8   :  { %v571_v50 = vpop.permute.xlu1 %570  ;;  %v870_v15 = vpack.c.bf16 %v577_v36, %v561_v60  ;;  %v888_v57 = vpack.c.bf16 %v578_v16, %v562_v1 }
 0x5a9   :  { %v572_v53 = vsel %vm131_vm1, %v569_v34, %v571_v50  ;;  %v575_v17 = vsel %vm131_vm1, %v571_v50, %v565_v43  ;;  %v617_v34 = vpop.permute.xlu0 %616 }
 0x5aa   :  { %v576_v25 = vmul.f32 %v575_v17, %v1106_v3  ;;  %v579_v27 = vmul.f32 %v572_v53, %v1121_v10  ;;  %871 = vmatprep.subr.bf16.mxu0 %v870_v15 }
 0x5ac   :  { %v872_v4 = vpack.c.bf16 %v576_v25, %v560_v54  ;;  %v583_v8 = vpop.permute.xlu1 %582  ;;  %v886_v39 = vpack.c.bf16 %v579_v27, %v563_v18 }
 0x5ad   :  { %v590_v2 = vsel %vm164_vm2, %v581_v35, %v583_v8  ;;  %v629_v10 = vpop.permute.xlu0 %628  ;;  %v589_v44 = vsel %vm164_vm2, %v583_v8, %v585_v42 }
 0x5ae   :  { %873 = vmatpush1.bf16.msra.mxu0 %v872_v4  ;;  %887 = vmatprep.subr.bf16.mxu1 %v886_v39  ;;  %v593_v47 = vmul.f32 %v590_v2, %v1147_v32 }
 0x5af   :  { %889 = vmatpush1.bf16.msra.mxu1 %v888_v57 }
 0x5b0   :  { %v587_v43 = vpop.permute.xlu1 %586 }
 0x5b1   :  { %v588_v52 = vsel %vm164_vm2, %v585_v42, %v587_v43  ;;  %v591_v60 = vsel %vm164_vm2, %v587_v43, %v581_v35  ;;  %v594_v42 = vmul.f32 %v589_v44, %v1179_v62  ;;  %v633_v16 = vpop.permute.xlu0 %632 }
 0x5b2   :  { %v595_v50 = vmul.f32 %v588_v52, %v1182_v0 }
 0x5b4   :  { %v599_v14 = vpop.permute.xlu1 %598 }
 0x5b5   :  { %v606_v3 = vsel %vm197_vm3, %v597_v11, %v599_v14  ;;  %v605_v13 = vsel %vm197_vm3, %v599_v14, %v601_v49  ;;  %v645_v27 = vpop.permute.xlu0 %644 }
 0x5b6   :  { %v609_v51 = vmul.f32 %v606_v3, %v1150_v33  ;;  %v610_v38 = vmul.f32 %v605_v13, %v1169_v55  ;;  %v592_v33 = vmul.f32 %v591_v60, %v1164_v48 }
 0x5b8   :  { %v603_v36 = vpop.permute.xlu1 %602  ;;  %v874_v6 = vpack.c.bf16 %v609_v51, %v593_v47  ;;  %v892_v54 = vpack.c.bf16 %v610_v38, %v594_v42 }
 0x5b9   :  { %v604_v32 = vsel %vm197_vm3, %v601_v49, %v603_v36  ;;  %v607_v41 = vsel %vm197_vm3, %v603_v36, %v597_v11 }
 0x5ba   :  { %v608_v15 = vmul.f32 %v607_v41, %v1160_v45  ;;  %v611_v35 = vmul.f32 %v604_v32, %v1172_v56  ;;  %875 = vmatprep.subr.bf16.mxu0 %v874_v6 }
 0x5bc   :  { %v876_v53 = vpack.c.bf16 %v608_v15, %v592_v33  ;;  %v615_v55 = vpop.permute.xlu1 %614  ;;  %v890_v17 = vpack.c.bf16 %v611_v35, %v595_v50 }
 0x5bd   :  { %v621_v49 = vsel %vm230_vm4, %v615_v55, %v617_v34  ;;  %v622_v48 = vsel %vm230_vm4, %v613_v20, %v615_v55 }
 0x5be   :  { %v624_v0 = vmul.f32 %v622_v48, %v1213_v28  ;;  %v625_v45 = vmul.f32 %v621_v49, %v1197_v19  ;;  %877 = vmatpush1.bf16.msra.mxu0 %v876_v53  ;;  %891 = vmatprep.subr.bf16.mxu1 %v890_v17 }
 0x5bf   :  { %893 = vmatpush1.bf16.msra.mxu1 %v892_v54 }
 0x5c0   :  { %v880_v56 = vpack.c.bf16 %v624_v0, %v1329_v21  ;;  %v619_v62 = vpop.permute.xlu1 %618  ;;  %v878_v11 = vpack.c.bf16 %v625_v45, %v1337_v26  ;;  %v649_v26 = vpop.permute.xlu0 %648 }
 0x5c1   :  { %v620_v18 = vsel %vm230_vm4, %v617_v34, %v619_v62  ;;  %v623_v25 = vsel %vm230_vm4, %v619_v62, %v613_v20 }
 0x5c2   :  { %v626_v1 = vmul.f32 %v620_v18, %v1205_v24  ;;  %v627_v28 = vmul.f32 %v623_v25, %v1216_v30  ;;  %879 = vmatprep.subr.bf16.mxu0 %v878_v11 }
 0x5c3   :  { %881 = vmatpush1.bf16.msra.mxu0 %v880_v56 }
 0x5c4   :  { %v896_v19 = vpack.c.bf16 %v626_v1, %v1331_v23  ;;  %v631_v4 = vpop.permute.xlu1 %630  ;;  %v894_v21 = vpack.c.bf16 %v627_v28, %v1347_v31  ;;  %v661_v57 = vpop.permute.xlu0 %660 }
 0x5c5   :  { %v637_v39 = vsel %vm263_vm5, %v631_v4, %v633_v16  ;;  %v638_v20 = vsel %vm263_vm5, %v629_v10, %v631_v4 }
 0x5c6   :  { %895 = vmatprep.subr.bf16.mxu1 %v894_v21  ;;  %v640_v31 = vmul.f32 %v638_v20, %v1250_v12  ;;  %v641_v34 = vmul.f32 %v637_v39, %v1233_v40 }
 0x5c7   :  { %897 = vmatpush1.bf16.msra.mxu1 %v896_v19 }
 0x5c8   :  { %v635_v8 = vpop.permute.xlu1 %634 }
 0x5c9   :  { %v636_v14 = vsel %vm263_vm5, %v633_v16, %v635_v8  ;;  %v639_v3 = vsel %vm263_vm5, %v635_v8, %v629_v10  ;;  %v665_v10 = vpop.permute.xlu0 %664 }
 0x5ca   :  { %v642_v40 = vmul.f32 %v636_v14, %v1265_v61 }
 0x5cc   :  { %v647_v24 = vpop.permute.xlu1 %646 }
 0x5cd   :  { %v653_v30 = vsel %vm296_vm6, %v647_v24, %v649_v26  ;;  %v654_v23 = vsel %vm296_vm6, %v645_v27, %v647_v24 }
 0x5ce   :  { %v656_v43 = vmul.f32 %v654_v23, %v1246_v9  ;;  %v657_v2 = vmul.f32 %v653_v30, %v1236_v5  ;;  %v643_v9 = vmul.f32 %v639_v3, %v1268_v22 }
 0x5d0   :  { %v884_v47 = vpack.c.bf16 %v656_v43, %v640_v31  ;;  %v651_v13 = vpop.permute.xlu1 %650  ;;  %v882_v51 = vpack.c.bf16 %v657_v2, %v641_v34 }
 0x5d1   :  { %v652_v52 = vsel %vm296_vm6, %v649_v26, %v651_v13  ;;  %v655_v12 = vsel %vm296_vm6, %v651_v13, %v645_v27 }
 0x5d2   :  { %v658_v5 = vmul.f32 %v652_v52, %v1255_v7  ;;  %v659_v60 = vmul.f32 %v655_v12, %v1258_v63  ;;  %883 = vmatprep.subr.bf16.mxu0 %v882_v51  ;;  %v676_v7 = vld [vmem:[%s1525_s7] sm:$0xff] }
 0x5d3   :  { %885 = vmatpush1.bf16.msra.mxu0 %v884_v47 }
 0x5d4   :  { %v900_v44 = vpack.c.bf16 %v658_v5, %v642_v40  ;;  %v663_v36 = vpop.permute.xlu1 %662  ;;  %v898_v6 = vpack.c.bf16 %v659_v60, %v643_v9 }
 0x5d5   :  { %v669_v38 = vsel %vm329_vm7, %v663_v36, %v665_v10  ;;  %v670_v32 = vsel %vm329_vm7, %v661_v57, %v663_v36 }
 0x5d6   :  { %v672_v61 = vmul.f32 %v1295_v37, %v670_v32  ;;  %v673_v22 = vmul.f32 %v1286_v29, %v669_v38  ;;  %899 = vmatprep.subr.bf16.mxu1 %v898_v6 }
 0x5d7   :  { %901 = vmatpush1.bf16.msra.mxu1 %v900_v44 }
 0x5d8   :  { %696 = vmatprep.subr.mxu0 %v673_v22  ;;  %v667_v63 = vpop.permute.xlu1 %666 }
 0x5d9   :  { %v668_v41 = vsel %vm329_vm7, %v665_v10, %v667_v63  ;;  %v671_v33 = vsel %vm329_vm7, %v667_v63, %v661_v57  ;;  %697 = vmatpush1.msra.mxu0 %v672_v61 }
 0x5da   :  { %v674_v50 = vmul.f32 %v1305_v59, %v668_v41  ;;  %v675_v37 = vmul.f32 %v1300_v58, %v671_v33  ;;  %836 = vmatmul.mubr.msk.f32.vlgmr.msra.gmra.mrb[2].mxu0 %vm355_vm8, %v676_v7 }
 0x5dc   :  { %767 = vmatprep.subr.mxu1 %v675_v37 }
 0x5dd   :  { %768 = vmatpush1.msra.mxu1 %v674_v50 }
 0x5de   :  { %837 = vmatmul.mubr.msk.f32.vlgmr.msra.gmra.mrb[2].mxu1 %vm355_vm8, %v676_v7 }
 0x6ad   :  { %v746_v29 = vpop.f32.mrb[2].mxu0 }
 0x6ae   :  { %822 = vst [vmem:[%s1526_s8] sm:$0xff] %v746_v29  ;;  %v748_v15 = vpop.f32.mrb[3].mxu0 }
 0x6af   :  { %823 = vst [vmem:[%s1526_s8 + $0x8] sm:$0xff] %v748_v15 }
 0x6b1   :  { %v817_v46 = vpop.f32.mrb[2].mxu1 }
 0x6b2   :  { %824 = vst [vmem:[%s1526_s8 + $0x10] sm:$0xff] %v817_v46  ;;  %v819_v58 = vpop.f32.mrb[3].mxu1 }
 0x6b3   :  { %825 = vst [vmem:[%s1526_s8 + $0x18] sm:$0xff] %v819_v58 }

</bundles_post_ra>
